<compile_context>
chip_gen: v5e
topology: v5e:2x2
jax: 0.10.0
libtpu: 0.0.40
codegen_flags: <defaults>
</compile_context>

<pallas_src>
import functools

import jax
import jax.numpy as jnp
from jax.experimental import pallas as pl
from jax.experimental.pallas import tpu as pltpu


def regretnet_kernel(x_ref, w0_ref, b0_ref, w1_ref, b1_ref, w2_ref, b2_ref,
                     wh_ref, bh_ref, dsel_ref, bsel_ref, isel_ref, out_ref,
                     *, n_agents, n_items):
    A, I = n_agents, n_items
    alloc_cols = (A + 1) * I

    x = x_ref[...]                                        # (TB, A*I) f32
    xb = x.astype(jnp.bfloat16)

    # Trunk MLP: bf16 MXU operands, f32 accumulation, tanh on the EUP.
    h = jnp.tanh(jnp.dot(xb, w0_ref[...],
                         preferred_element_type=jnp.float32) + b0_ref[...])
    h = jnp.tanh(jnp.dot(h.astype(jnp.bfloat16), w1_ref[...],
                         preferred_element_type=jnp.float32) + b1_ref[...])
    h = jnp.tanh(jnp.dot(h.astype(jnp.bfloat16), w2_ref[...],
                         preferred_element_type=jnp.float32) + b2_ref[...])

    # Fused heads: one matmul producing [alloc logits | payment logits].
    head = jnp.dot(h.astype(jnp.bfloat16), wh_ref[...],
                   preferred_element_type=jnp.float32) + bh_ref[...]
    logits = head[:, :alloc_cols]                         # (TB, (A+1)*I)
    p = head[:, alloc_cols:]                              # (TB, A)
    pay_frac = 0.5 * (jnp.tanh(0.5 * p) + 1.0)            # sigmoid via EUP tanh

    # Agent-axis softmax on the flat slab, without per-agent slices/concats.
    # Per-row max is a valid stabilizer (same constant within each softmax
    # group -> identical probabilities; all exponents <= 0).
    m = jnp.max(logits, axis=-1, keepdims=True)           # (TB, 1)   XLU
    e = jnp.exp(logits - m)                               # (TB, (A+1)*I) EUP
    denom = jnp.dot(e, dsel_ref[...],
                    preferred_element_type=jnp.float32)   # (TB, I)  per-item sums
    inv = pl.reciprocal(denom, approx=True)               # EUP slot
    inv = inv * (2.0 - denom * inv)                       # one Newton step
    inv_full = jnp.dot(inv, bsel_ref[...],
                       preferred_element_type=jnp.float32)  # (TB, A*I) broadcast

    # View_Cut: keep only agents 0..A-1 (first A*I softmax columns).
    alloc = e[:, :A * I] * inv_full                       # (TB, A*I)

    # payments[:, a] = sigmoid(p)[:, a] * sum_i alloc[:, a, i] * reports[:, a, i]
    item_sums = jnp.dot(alloc * x, isel_ref[...],
                        preferred_element_type=jnp.float32)  # (TB, A)
    pay = pay_frac * item_sums

    # Single fused, dense store: [alloc | payments].
    out_ref[...] = jnp.concatenate([alloc, pay], axis=-1)


def _round_up(n, m):
    return ((n + m - 1) // m) * m


def _cdiv(a, b):
    return -(-a // b)


def _choose_batch_tile(B, *, max_tb=4096):
    """Few, fat batch tiles; padding bounded by < tb rows.  When there are
    enough rows, force an even tile count >= 2 so the single 'parallel' grid
    axis splits evenly across both TensorCores on v7x."""
    if B <= 8:
        return 8
    n_tiles = max(1, _cdiv(B, max_tb))
    if B >= 16:
        n_tiles = max(2, n_tiles)
        if n_tiles % 2:
            n_tiles += 1
    return _round_up(_cdiv(B, n_tiles), 8)


def regretnet_forward(reports, params, *, n_agents, n_items,
                      max_block_rows=4096):
    B = reports.shape[0]
    A, I = n_agents, n_items
    (w0, b0, w1, b1, w2, b2, wa, ba, wp, bp) = params
    H = w0.shape[1]
    alloc_cols = (A + 1) * I
    head_out = alloc_cols + A
    out_cols = A * I + A

    # Fuse allocation + payment heads into one matmul; stage matmul weights
    # as bf16 (accumulation stays f32 in-kernel).  Biases stay f32.
    wh = jnp.concatenate([wa, wp], axis=1)                 # (H, (A+1)*I + A)
    bh = jnp.concatenate([ba, bp], axis=1)                 # (1, (A+1)*I + A)
    w0b, w1b, w2b, whb = (w.astype(jnp.bfloat16) for w in (w0, w1, w2, wh))

    # 0/1 selector matrices (tiny, VMEM resident, ride MXU slack in-kernel).
    item_ids = jnp.tile(jnp.arange(I), A + 1)              # column -> item idx
    agent_ids = jnp.repeat(jnp.arange(A + 1), I)           # column -> agent idx
    dsel = (item_ids[:, None] == jnp.arange(I)[None, :]).astype(jnp.float32)
    bsel = dsel[:A * I].T                                  # (I, A*I)
    isel = (agent_ids[:A * I, None] == jnp.arange(A)[None, :]).astype(jnp.float32)

    x = reports.reshape(B, A * I).astype(jnp.float32)

    tb = _choose_batch_tile(B, max_tb=max(8, max_block_rows))
    B_pad = _round_up(B, tb)
    if B_pad != B:
        x = jnp.pad(x, ((0, B_pad - B), (0, 0)))
    grid = (B_pad // tb,)

    def row_block(cols):
        return pl.BlockSpec((tb, cols), lambda i: (i, 0))

    def full_block(arr):
        return pl.BlockSpec(arr.shape, lambda i: (0,) * arr.ndim)  # VMEM resident

    consts = (w0b, b0, w1b, b1, w2b, b2, whb, bh, dsel, bsel, isel)
    # NOTE: at production hidden sizes on v7x (64 MiB VMEM), stage these
    # resident weights bf16 (done) and set vmem_limit_bytes explicitly.

    flops = int(2 * B_pad * (A * I * H + 2 * H * H + H * head_out
                             + alloc_cols * I + I * A * I + A * I * A))
    transcendentals = int(B_pad * (3 * H + A + alloc_cols + I))
    bytes_accessed = int(4 * B_pad * (A * I + out_cols)
                         + sum(int(c.size) * c.dtype.itemsize for c in consts))

    kernel = functools.partial(regretnet_kernel, n_agents=A, n_items=I)

    fused = pl.pallas_call(
        kernel,
        out_shape=jax.ShapeDtypeStruct((B_pad, out_cols), jnp.float32),
        grid=grid,
        in_specs=[row_block(A * I)] + [full_block(c) for c in consts],
        out_specs=row_block(out_cols),
        compiler_params=pltpu.CompilerParams(
            dimension_semantics=("parallel",)),
        cost_estimate=pl.CostEstimate(flops=flops,
                                      transcendentals=transcendentals,
                                      bytes_accessed=bytes_accessed),
    )(x, *consts)

    allocs = fused[:B, :A * I].reshape(B, A, I)
    payments = fused[:B, A * I:]
    return allocs, payments


def glorot_uniform(key, fan_in, fan_out):
    limit = (6.0 / (fan_in + fan_out)) ** 0.5
    return jax.random.uniform(key, (fan_in, fan_out), jnp.float32, -limit, limit)


def make_params(key, n_agents, n_items, hidden):
    in_size = n_agents * n_items
    alloc_size = (n_agents + 1) * n_items
    pay_size = n_agents
    ks = jax.random.split(key, 10)
    # weights stored (in, out); biases stored (1, out)
    w0 = glorot_uniform(ks[0], in_size, hidden)
    b0 = jax.random.uniform(ks[1], (1, hidden), jnp.float32, -0.1, 0.1)
    w1 = glorot_uniform(ks[2], hidden, hidden)
    b1 = jax.random.uniform(ks[3], (1, hidden), jnp.float32, -0.1, 0.1)
    w2 = glorot_uniform(ks[4], hidden, hidden)
    b2 = jax.random.uniform(ks[5], (1, hidden), jnp.float32, -0.1, 0.1)
    wa = glorot_uniform(ks[6], hidden, alloc_size)
    ba = jax.random.uniform(ks[7], (1, alloc_size), jnp.float32, -0.1, 0.1)
    wp = glorot_uniform(ks[8], hidden, pay_size)
    bp = jax.random.uniform(ks[9], (1, pay_size), jnp.float32, -0.1, 0.1)
    return (w0, b0, w1, b1, w2, b2, wa, ba, wp, bp)


def reference_forward(reports, params, *, n_agents, n_items):
    (w0, b0, w1, b1, w2, b2, wa, ba, wp, bp) = params
    B = reports.shape[0]
    x = reports.reshape(B, n_agents * n_items)
    h = jnp.tanh(x @ w0 + b0)
    h = jnp.tanh(h @ w1 + b1)
    h = jnp.tanh(h @ w2 + b2)
    logits = (h @ wa + ba).reshape(B, n_agents + 1, n_items)
    probs = jax.nn.softmax(logits, axis=1)
    allocs = probs[:, :-1, :]                    # View_Cut: x[:, :-1, :]
    pay = jax.nn.sigmoid(h @ wp + bp) * jnp.sum(allocs * reports, axis=2)
    return allocs, pay


if __name__ == "__main__":
    n_agents, n_items, hidden = 3, 4, 32
    batch = 2

    key = jax.random.PRNGKey(0)
    k_params, k_reports = jax.random.split(key)
    params = make_params(k_params, n_agents, n_items, hidden)
    reports = jax.random.uniform(k_reports, (batch, n_agents, n_items),
                                 jnp.float32)

    allocs, payments = regretnet_forward(reports, params,
                                         n_agents=n_agents, n_items=n_items)
    jax.block_until_ready((allocs, payments))

    ref_allocs, ref_payments = reference_forward(reports, params,
                                                 n_agents=n_agents,
                                                 n_items=n_items)

    assert allocs.shape == (batch, n_agents, n_items)
    assert payments.shape == (batch, n_agents)
    # bf16 MXU operands (with f32 accumulation) give ~1e-3-level deviations
    # from the pure-f32 reference; tolerance is set accordingly.
    assert jnp.allclose(allocs, ref_allocs, atol=3e-2, rtol=3e-2)
    assert jnp.allclose(payments, ref_payments, atol=3e-2, rtol=3e-2)

    print("KERNEL_OK")
</pallas_src>

<mosaic_0001>
module attributes {stable_mosaic.version = 11 : i64} {
  func.func @regretnet_kernel(%arg0: i32, %arg1: memref<8x12xf32, #tpu.memory_space<vmem>>, %arg2: memref<12x32xbf16, #tpu.memory_space<vmem>>, %arg3: memref<1x32xf32, #tpu.memory_space<vmem>>, %arg4: memref<32x32xbf16, #tpu.memory_space<vmem>>, %arg5: memref<1x32xf32, #tpu.memory_space<vmem>>, %arg6: memref<32x32xbf16, #tpu.memory_space<vmem>>, %arg7: memref<1x32xf32, #tpu.memory_space<vmem>>, %arg8: memref<32x19xbf16, #tpu.memory_space<vmem>>, %arg9: memref<1x19xf32, #tpu.memory_space<vmem>>, %arg10: memref<16x4xf32, #tpu.memory_space<vmem>>, %arg11: memref<4x12xf32, #tpu.memory_space<vmem>>, %arg12: memref<12x3xf32, #tpu.memory_space<vmem>>, %arg13: memref<8x15xf32, #tpu.memory_space<vmem>>) attributes {dimension_semantics = [#tpu.dimension_semantics<parallel>], iteration_bounds = array<i64: 1>, scalar_prefetch = 0 : i64, scratch_operands = 0 : i64, tpu.core_type = #tpu.core_type<tc>, window_params = [{transform_indices = @transform_0, window_bounds = array<i64: 8, 12>}, {pipeline_mode = #tpu.pipeline_mode<synchronous>, transform_indices = @transform_1, window_bounds = array<i64: 12, 32>}, {pipeline_mode = #tpu.pipeline_mode<synchronous>, transform_indices = @transform_2, window_bounds = array<i64: 1, 32>}, {pipeline_mode = #tpu.pipeline_mode<synchronous>, transform_indices = @transform_3, window_bounds = array<i64: 32, 32>}, {pipeline_mode = #tpu.pipeline_mode<synchronous>, transform_indices = @transform_4, window_bounds = array<i64: 1, 32>}, {pipeline_mode = #tpu.pipeline_mode<synchronous>, transform_indices = @transform_5, window_bounds = array<i64: 32, 32>}, {pipeline_mode = #tpu.pipeline_mode<synchronous>, transform_indices = @transform_6, window_bounds = array<i64: 1, 32>}, {pipeline_mode = #tpu.pipeline_mode<synchronous>, transform_indices = @transform_7, window_bounds = array<i64: 32, 19>}, {pipeline_mode = #tpu.pipeline_mode<synchronous>, transform_indices = @transform_8, window_bounds = array<i64: 1, 19>}, {pipeline_mode = #tpu.pipeline_mode<synchronous>, transform_indices = @transform_9, window_bounds = array<i64: 16, 4>}, {pipeline_mode = #tpu.pipeline_mode<synchronous>, transform_indices = @transform_10, window_bounds = array<i64: 4, 12>}, {pipeline_mode = #tpu.pipeline_mode<synchronous>, transform_indices = @transform_11, window_bounds = array<i64: 12, 3>}, {transform_indices = @transform_12, window_bounds = array<i64: 8, 15>}]} {
    %c0 = arith.constant 0 : index
    %c0_0 = arith.constant 0 : index
    %0 = vector.load %arg1[%c0, %c0_0] : memref<8x12xf32, #tpu.memory_space<vmem>>, vector<8x12xf32>
    %1 = arith.truncf %0 : vector<8x12xf32> to vector<8x12xbf16>
    %c0_1 = arith.constant 0 : index
    %c0_2 = arith.constant 0 : index
    %2 = vector.load %arg2[%c0_1, %c0_2] : memref<12x32xbf16, #tpu.memory_space<vmem>>, vector<12x32xbf16>
    %cst = arith.constant dense<0.000000e+00> : vector<8x32xf32>
    %3 = tpu.matmul %1, %2, %cst {dimension_numbers = #tpu.dot_dimension_numbers<[1], [0], [0], [1], [0, 0, 1, 1], [], []>} : vector<8x12xbf16>, vector<12x32xbf16>, vector<8x32xf32> -> vector<8x32xf32>
    %c0_3 = arith.constant 0 : index
    %c0_4 = arith.constant 0 : index
    %4 = vector.load %arg3[%c0_3, %c0_4] : memref<1x32xf32, #tpu.memory_space<vmem>>, vector<1x32xf32>
    %5 = vector.broadcast %4 : vector<1x32xf32> to vector<8x32xf32>
    %6 = arith.addf %3, %5 : vector<8x32xf32>
    %7 = math.tanh %6 : vector<8x32xf32>
    %8 = arith.truncf %7 : vector<8x32xf32> to vector<8x32xbf16>
    %c0_5 = arith.constant 0 : index
    %c0_6 = arith.constant 0 : index
    %9 = vector.load %arg4[%c0_5, %c0_6] : memref<32x32xbf16, #tpu.memory_space<vmem>>, vector<32x32xbf16>
    %cst_7 = arith.constant dense<0.000000e+00> : vector<8x32xf32>
    %10 = tpu.matmul %8, %9, %cst_7 {dimension_numbers = #tpu.dot_dimension_numbers<[1], [0], [0], [1], [0, 0, 1, 1], [], []>} : vector<8x32xbf16>, vector<32x32xbf16>, vector<8x32xf32> -> vector<8x32xf32>
    %c0_8 = arith.constant 0 : index
    %c0_9 = arith.constant 0 : index
    %11 = vector.load %arg5[%c0_8, %c0_9] : memref<1x32xf32, #tpu.memory_space<vmem>>, vector<1x32xf32>
    %12 = vector.broadcast %11 : vector<1x32xf32> to vector<8x32xf32>
    %13 = arith.addf %10, %12 : vector<8x32xf32>
    %14 = math.tanh %13 : vector<8x32xf32>
    %15 = arith.truncf %14 : vector<8x32xf32> to vector<8x32xbf16>
    %c0_10 = arith.constant 0 : index
    %c0_11 = arith.constant 0 : index
    %16 = vector.load %arg6[%c0_10, %c0_11] : memref<32x32xbf16, #tpu.memory_space<vmem>>, vector<32x32xbf16>
    %cst_12 = arith.constant dense<0.000000e+00> : vector<8x32xf32>
    %17 = tpu.matmul %15, %16, %cst_12 {dimension_numbers = #tpu.dot_dimension_numbers<[1], [0], [0], [1], [0, 0, 1, 1], [], []>} : vector<8x32xbf16>, vector<32x32xbf16>, vector<8x32xf32> -> vector<8x32xf32>
    %c0_13 = arith.constant 0 : index
    %c0_14 = arith.constant 0 : index
    %18 = vector.load %arg7[%c0_13, %c0_14] : memref<1x32xf32, #tpu.memory_space<vmem>>, vector<1x32xf32>
    %19 = vector.broadcast %18 : vector<1x32xf32> to vector<8x32xf32>
    %20 = arith.addf %17, %19 : vector<8x32xf32>
    %21 = math.tanh %20 : vector<8x32xf32>
    %22 = arith.truncf %21 : vector<8x32xf32> to vector<8x32xbf16>
    %c0_15 = arith.constant 0 : index
    %c0_16 = arith.constant 0 : index
    %23 = vector.load %arg8[%c0_15, %c0_16] : memref<32x19xbf16, #tpu.memory_space<vmem>>, vector<32x19xbf16>
    %cst_17 = arith.constant dense<0.000000e+00> : vector<8x19xf32>
    %24 = tpu.matmul %22, %23, %cst_17 {dimension_numbers = #tpu.dot_dimension_numbers<[1], [0], [0], [1], [0, 0, 1, 1], [], []>} : vector<8x32xbf16>, vector<32x19xbf16>, vector<8x19xf32> -> vector<8x19xf32>
    %c0_18 = arith.constant 0 : index
    %c0_19 = arith.constant 0 : index
    %25 = vector.load %arg9[%c0_18, %c0_19] : memref<1x19xf32, #tpu.memory_space<vmem>>, vector<1x19xf32>
    %26 = vector.broadcast %25 : vector<1x19xf32> to vector<8x19xf32>
    %27 = arith.addf %24, %26 : vector<8x19xf32>
    %28 = vector.extract_strided_slice %27 {offsets = [0, 0], sizes = [8, 16], strides = [1, 1]} : vector<8x19xf32> to vector<8x16xf32>
    %29 = vector.extract_strided_slice %27 {offsets = [0, 16], sizes = [8, 3], strides = [1, 1]} : vector<8x19xf32> to vector<8x3xf32>
    %cst_20 = arith.constant 5.000000e-01 : f32
    %30 = vector.broadcast %cst_20 : f32 to vector<8x3xf32>
    %31 = arith.mulf %30, %29 : vector<8x3xf32>
    %32 = math.tanh %31 : vector<8x3xf32>
    %cst_21 = arith.constant 1.000000e+00 : f32
    %33 = vector.broadcast %cst_21 : f32 to vector<8x3xf32>
    %34 = arith.addf %32, %33 : vector<8x3xf32>
    %cst_22 = arith.constant 5.000000e-01 : f32
    %35 = vector.broadcast %cst_22 : f32 to vector<8x3xf32>
    %36 = arith.mulf %35, %34 : vector<8x3xf32>
    %cst_23 = arith.constant dense<0xFF800000> : vector<8xf32>
    %37 = vector.multi_reduction <maximumf>, %28, %cst_23 [1] : vector<8x16xf32> to vector<8xf32>
    %38 = vector.shape_cast %37 : vector<8xf32> to vector<8x1xf32>
    %39 = vector.broadcast %38 : vector<8x1xf32> to vector<8x16xf32>
    %40 = arith.subf %28, %39 : vector<8x16xf32>
    %41 = math.exp %40 : vector<8x16xf32>
    %c0_24 = arith.constant 0 : index
    %c0_25 = arith.constant 0 : index
    %42 = vector.load %arg10[%c0_24, %c0_25] : memref<16x4xf32, #tpu.memory_space<vmem>>, vector<16x4xf32>
    %cst_26 = arith.constant dense<0.000000e+00> : vector<8x4xf32>
    %43 = tpu.matmul %41, %42, %cst_26 {dimension_numbers = #tpu.dot_dimension_numbers<[1], [0], [0], [1], [0, 0, 1, 1], [], []>} : vector<8x16xf32>, vector<16x4xf32>, vector<8x4xf32> -> vector<8x4xf32>
    %44 = tpu.reciprocal %43 {approx = true} : vector<8x4xf32> -> vector<8x4xf32>
    %45 = arith.mulf %43, %44 : vector<8x4xf32>
    %cst_27 = arith.constant 2.000000e+00 : f32
    %46 = vector.broadcast %cst_27 : f32 to vector<8x4xf32>
    %47 = arith.subf %46, %45 : vector<8x4xf32>
    %48 = arith.mulf %44, %47 : vector<8x4xf32>
    %c0_28 = arith.constant 0 : index
    %c0_29 = arith.constant 0 : index
    %49 = vector.load %arg11[%c0_28, %c0_29] : memref<4x12xf32, #tpu.memory_space<vmem>>, vector<4x12xf32>
    %cst_30 = arith.constant dense<0.000000e+00> : vector<8x12xf32>
    %50 = tpu.matmul %48, %49, %cst_30 {dimension_numbers = #tpu.dot_dimension_numbers<[1], [0], [0], [1], [0, 0, 1, 1], [], []>} : vector<8x4xf32>, vector<4x12xf32>, vector<8x12xf32> -> vector<8x12xf32>
    %51 = vector.extract_strided_slice %41 {offsets = [0, 0], sizes = [8, 12], strides = [1, 1]} : vector<8x16xf32> to vector<8x12xf32>
    %52 = arith.mulf %51, %50 : vector<8x12xf32>
    %53 = arith.mulf %52, %0 : vector<8x12xf32>
    %c0_31 = arith.constant 0 : index
    %c0_32 = arith.constant 0 : index
    %54 = vector.load %arg12[%c0_31, %c0_32] : memref<12x3xf32, #tpu.memory_space<vmem>>, vector<12x3xf32>
    %cst_33 = arith.constant dense<0.000000e+00> : vector<8x3xf32>
    %55 = tpu.matmul %53, %54, %cst_33 {dimension_numbers = #tpu.dot_dimension_numbers<[1], [0], [0], [1], [0, 0, 1, 1], [], []>} : vector<8x12xf32>, vector<12x3xf32>, vector<8x3xf32> -> vector<8x3xf32>
    %56 = arith.mulf %36, %55 : vector<8x3xf32>
    %57 = tpu.concatenate %52, %56 in 1 : vector<8x12xf32>, vector<8x3xf32> -> vector<8x15xf32>
    %c0_34 = arith.constant 0 : index
    %c0_35 = arith.constant 0 : index
    %58 = vector.load %arg13[%c0_34, %c0_35] : memref<8x15xf32, #tpu.memory_space<vmem>>, vector<8x15xf32>
    tpu.vector_store %arg13[%c0_34, %c0_35], %57 {strides = array<i32>} : memref<8x15xf32, #tpu.memory_space<vmem>>, vector<8x15xf32>,
    return
  }
  func.func @transform_0(%arg0: i32) -> (i32, i32) {
    %c0_i32 = arith.constant 0 : i32
    %c0_i32_0 = arith.constant 0 : i32
    return %arg0, %c0_i32 : i32, i32
  }
  func.func @transform_1(%arg0: i32) -> (i32, i32) {
    %c0_i32 = arith.constant 0 : i32
    %c0_i32_0 = arith.constant 0 : i32
    %c0_i32_1 = arith.constant 0 : i32
    return %c0_i32, %c0_i32_0 : i32, i32
  }
  func.func @transform_2(%arg0: i32) -> (i32, i32) {
    %c0_i32 = arith.constant 0 : i32
    %c0_i32_0 = arith.constant 0 : i32
    %c0_i32_1 = arith.constant 0 : i32
    return %c0_i32, %c0_i32_0 : i32, i32
  }
  func.func @transform_3(%arg0: i32) -> (i32, i32) {
    %c0_i32 = arith.constant 0 : i32
    %c0_i32_0 = arith.constant 0 : i32
    %c0_i32_1 = arith.constant 0 : i32
    return %c0_i32, %c0_i32_0 : i32, i32
  }
  func.func @transform_4(%arg0: i32) -> (i32, i32) {
    %c0_i32 = arith.constant 0 : i32
    %c0_i32_0 = arith.constant 0 : i32
    %c0_i32_1 = arith.constant 0 : i32
    return %c0_i32, %c0_i32_0 : i32, i32
  }
  func.func @transform_5(%arg0: i32) -> (i32, i32) {
    %c0_i32 = arith.constant 0 : i32
    %c0_i32_0 = arith.constant 0 : i32
    %c0_i32_1 = arith.constant 0 : i32
    return %c0_i32, %c0_i32_0 : i32, i32
  }
  func.func @transform_6(%arg0: i32) -> (i32, i32) {
    %c0_i32 = arith.constant 0 : i32
    %c0_i32_0 = arith.constant 0 : i32
    %c0_i32_1 = arith.constant 0 : i32
    return %c0_i32, %c0_i32_0 : i32, i32
  }
  func.func @transform_7(%arg0: i32) -> (i32, i32) {
    %c0_i32 = arith.constant 0 : i32
    %c0_i32_0 = arith.constant 0 : i32
    %c0_i32_1 = arith.constant 0 : i32
    return %c0_i32, %c0_i32_0 : i32, i32
  }
  func.func @transform_8(%arg0: i32) -> (i32, i32) {
    %c0_i32 = arith.constant 0 : i32
    %c0_i32_0 = arith.constant 0 : i32
    %c0_i32_1 = arith.constant 0 : i32
    return %c0_i32, %c0_i32_0 : i32, i32
  }
  func.func @transform_9(%arg0: i32) -> (i32, i32) {
    %c0_i32 = arith.constant 0 : i32
    %c0_i32_0 = arith.constant 0 : i32
    %c0_i32_1 = arith.constant 0 : i32
    return %c0_i32, %c0_i32_0 : i32, i32
  }
  func.func @transform_10(%arg0: i32) -> (i32, i32) {
    %c0_i32 = arith.constant 0 : i32
    %c0_i32_0 = arith.constant 0 : i32
    %c0_i32_1 = arith.constant 0 : i32
    return %c0_i32, %c0_i32_0 : i32, i32
  }
  func.func @transform_11(%arg0: i32) -> (i32, i32) {
    %c0_i32 = arith.constant 0 : i32
    %c0_i32_0 = arith.constant 0 : i32
    %c0_i32_1 = arith.constant 0 : i32
    return %c0_i32, %c0_i32_0 : i32, i32
  }
  func.func @transform_12(%arg0: i32) -> (i32, i32) {
    %c0_i32 = arith.constant 0 : i32
    %c0_i32_0 = arith.constant 0 : i32
    return %arg0, %c0_i32 : i32, i32
  }
}

</mosaic_0001>

<bundles_post_ra>
// kernel: tpu_custom_call.1
= control target key start
LH: loop header
LB: loop body
LE: loop exit
PB: predicated region body
PF: predicated region fallthrough
CT: control target
= control target key end

     0   :  { %vm60_vm0 = vcmask 1045504   ;;  %s544_s0 = inlined_call_operand.vmem [shape: f32[8,12], index: 0, kind: input, shape index: {}]   ;;  %s545_s1 = inlined_call_operand.vmem [shape: bf16[12,32], index: 1, kind: input, shape index: {}]   ;;  %s546_s2 = inlined_call_operand.vmem [shape: f32[1,32], index: 2, kind: input, shape index: {}]   ;;  %s547_s3 = inlined_call_operand.vmem [shape: bf16[32,32], index: 3, kind: input, shape index: {}]   ;;  %s548_s4 = inlined_call_operand.vmem [shape: f32[1,32], index: 4, kind: input, shape index: {}]   ;;  %s549_s5 = inlined_call_operand.vmem [shape: bf16[32,32], index: 5, kind: input, shape index: {}]   ;;  %s550_s6 = inlined_call_operand.vmem [shape: f32[1,32], index: 6, kind: input, shape index: {}]   ;;  %s551_s7 = inlined_call_operand.vmem [shape: bf16[32,19], index: 7, kind: input, shape index: {}]   ;;  %s552_s8 = inlined_call_operand.vmem [shape: f32[1,19], index: 8, kind: input, shape index: {}]   ;;  %s553_s9 = inlined_call_operand.vmem [shape: f32[16,4], index: 9, kind: input, shape index: {}]   ;;  %s554_s10 = inlined_call_operand.vmem [shape: f32[4,12], index: 10, kind: input, shape index: {}]   ;;  %s555_s11 = inlined_call_operand.vmem [shape: f32[12,3], index: 11, kind: input, shape index: {}]   ;;  %s556_s12 = inlined_call_operand.hbm [shape: f32[8,15], index: 12, kind: output, shape index: {}]  }
   0x1   :  { %v321_v0 = vld [vmem:[%s545_s1] sm:$0xf]  ;;  %v356_v1 = vld [vmem:[%s545_s1] sm:$0x30] }
   0x2   :  { %v485_v2 = vld [vmem:[%s544_s0] sm:$0xff]  ;;  %v322_v3 = vor.u32 %v356_v1, %v321_v0 }
   0x3   :  { %v44_v5 = vpack.c.bf16 %v485_v2, %v485_v2 }
   0x4   :  { %v62_v4 = vsel %vm60_vm0, %v322_v3, 0 }
   0x5   :  { %17 = vsyncpa [#allocation3], 0  ;;  %71 = vmatpush.bf16.msra.mxu0 %v62_v4  ;;  %vm56_vm1 = vcmask 97280   ;;  %v358_v6 = vld [vmem:[%s547_s3 + $0x8] sm:$0xff]  ;;  %v357_v7 = vld [vmem:[%s547_s3] sm:$0xff]  ;;  %vm99_vm2 = vcmask 261120  }
   0x6   :  { %109 = vmatpush.bf16.msra.mxu1 %v358_v6  ;;  %v366_v8 = vld [vmem:[%s546_s2] ss:$0 sm:$0xff]  ;;  %v360_v14 = vld [vmem:[%s549_s5 + $0x8] sm:$0xff]  ;;  %vm196_vm3 = vcmask 130048   ;;  %vm237_vm4 = vcmask 1043456   ;;  %vm233_vm5 = vcmask 31744  }
   0x7   :  { %147 = vmatpush.bf16.msra.mxu2 %v360_v14  ;;  %v359_v15 = vld [vmem:[%s549_s5] sm:$0xff]  ;;  %v362_v22 = vld [vmem:[%s551_s7 + $0x8] sm:$0xff]  ;;  %s310_s13 = sshll.u32 %s556_s12, 4  ;;  %vm301_vm6 = vcmask 121856   ;;  %s311_s13 = int_to_ptr.hbm [resolvable:$true] %s310_s13 }
   0x8   :  { %323 = vmatmul.msk.bf16.vlgmr.msra.gmra.mxu0 %vm56_vm1, %v44_v5  ;;  %v367_v16 = vld [vmem:[%s548_s4] ss:$0 sm:$0xff]  ;;  %185 = vmatpush.bf16.msra.mxu3 %v362_v22  ;;  %v204_v30 = vld [vmem:[%s553_s9 + $0x8] sm:$0xff] }
   0x9   :  { %v361_v23 = vld [vmem:[%s551_s7] sm:$0xff]  ;;  %222 = vmatpush.msrb.mxu0 %v204_v30  ;;  %v264_v42 = vld [vmem:[%s555_s11 + $0x8] sm:$0xf] }
   0xa   :  { %110 = vmatpush.bf16.msra.mxu1 %v357_v7  ;;  %v368_v24 = vld [vmem:[%s550_s6] ss:$0 sm:$0xff] }
   0xb   :  { %148 = vmatpush.bf16.msra.mxu2 %v359_v15  ;;  %v369_v31 = vld [vmem:[%s552_s8] ss:$0 sm:$0xff] }
   0xc   :  { %186 = vmatpush.bf16.msra.mxu3 %v361_v23  ;;  %v203_v36 = vld [vmem:[%s553_s9] sm:$0xff]  ;;  %s408_s9 = smov 16  }
   0xd   :  { %223 = vmatpush.msrb.mxu0 %v203_v36  ;;  %v232_v37 = vld [vmem:[%s554_s10] sm:$0xf]  ;;  %s409_s10 = smov 124  }
   0xe   :  { %352 = vmatpush.msk.msrb.mxu1 %vm237_vm4, %v232_v37  ;;  %v263_v43 = vld [vmem:[%s555_s11] sm:$0xff]  ;;  %s410_s11 = smov [#allocation2]  }
   0xf   :  { %354 = vmatpush.msk.msrb.mxu2 %vm237_vm4, %v264_v42  ;;  %s308_s29 = sshll.u32 %s410_s11, 4  ;;  %s309_s29 = int_to_ptr.vmem [resolvable:$true] %s308_s29 }
  0x11   :  { %286 = vmatpush.msrb.mxu2 %v263_v43 }
  0x85   :  { %v73_v9 = vpop.f32.mrf.mxu0 }
  0x86   :  { %v74_v10 = vadd.f32 %v366_v8, %v73_v9 }
  0x88   :  { %370 = vtanh.f32 %v74_v10 }
  0x8d   :  { %v75_v11 = vpop.f32.mrf.mxu0 }
  0x8e   :  { %v371_v12 = vpop.eup %370 }
  0x8f   :  { %v78_v13 = vpack.c.bf16 %v371_v12, %v371_v12 }
  0x91   :  { %332 = vmatmul.msk.bf16.vlgmr.msra.gmra.mxu1 %vm99_vm2, %v78_v13 }
 0x10e   :  { %v112_v17 = vpop.f32.mrf.mxu1 }
 0x10f   :  { %v113_v18 = vadd.f32 %v367_v16, %v112_v17 }
 0x111   :  { %372 = vtanh.f32 %v113_v18 }
 0x116   :  { %v114_v19 = vpop.f32.mrf.mxu1 }
 0x117   :  { %v373_v20 = vpop.eup %372 }
 0x118   :  { %v117_v21 = vpack.c.bf16 %v373_v20, %v373_v20 }
 0x11a   :  { %341 = vmatmul.msk.bf16.vlgmr.msra.gmra.mxu2 %vm99_vm2, %v117_v21 }
 0x19d   :  { %v150_v25 = vpop.f32.mrf.mxu2 }
 0x19e   :  { %v151_v26 = vadd.f32 %v368_v24, %v150_v25 }
 0x1a0   :  { %374 = vtanh.f32 %v151_v26 }
 0x1a5   :  { %v152_v27 = vpop.f32.mrf.mxu2 }
 0x1a6   :  { %v375_v28 = vpop.eup %374 }
 0x1a7   :  { %v155_v29 = vpack.c.bf16 %v375_v28, %v375_v28 }
 0x1a9   :  { %350 = vmatmul.msk.bf16.vlgmr.msra.gmra.mxu3 %vm99_vm2, %v155_v29 }
 0x22c   :  { %v188_v32 = vpop.f32.mrf.mxu3 }
 0x22d   :  { %v189_v33 = vadd.f32 %v369_v31, %v188_v32 }
 0x22f   :  { %v197_v34 = vsel %vm196_vm3, %v189_v33, -inf  ;;  %v192_v53 = vmul.f32 0.5, %v189_v33 }
 0x230   :  { %198 = vmax.xlane.f32.xlu0 %v197_v34 }
 0x234   :  { %v190_v35 = vpop.f32.mrf.mxu3 }
 0x2a3   :  { %v199_v38 = vpop.xlane.xlu0 %198 }
 0x2a4   :  { %v200_v39 = vsub.f32 %v189_v33, %v199_v38 }
 0x2a6   :  { %v201_v40 = vmul.f32 1.442695, %v200_v39 }
 0x2a8   :  { %376 = vpow2.f32 %v201_v40 }
 0x2ae   :  { %v377_v41 = vpop.eup %376 }
 0x2af   :  { %351 = vmatmul.msk.f32.vlgmr.msrb.gmra.mxu0 %vm196_vm3, %v377_v41 }
 0x32c   :  { %v225_v44 = vpop.f32.mrf.mxu0 }
 0x32d   :  { %378 = vrcp.f32 %v225_v44 }
 0x32e   :  { %380 = vtanh.f32 %v192_v53 }
 0x333   :  { %v379_v45 = vpop.eup %378 }
 0x334   :  { %v229_v46 = vmul.f32 %v379_v45, %v225_v44  ;;  %v381_v54 = vpop.eup %380 }
 0x335   :  { %v194_v55 = vadd.f32 1.0, %v381_v54 }
 0x336   :  { %v230_v47 = vsub.f32 2.0, %v229_v46 }
 0x337   :  { %v195_v56 = vmul.f32 0.5, %v194_v55 }
 0x338   :  { %v231_v48 = vmul.f32 %v379_v45, %v230_v47 }
 0x33a   :  { %353 = vmatmul.msk.f32.vlgmr.msrb.gmra.mxu1 %vm233_vm5, %v231_v48 }
 0x3b7   :  { %v258_v49 = vpop.f32.mrf.mxu1 }
 0x3b8   :  { %v261_v50 = vmul.f32 %v377_v41, %v258_v49 }
 0x3ba   :  { %v262_v51 = vmul.f32 %v261_v50, %v485_v2 }
 0x3bc   :  { %355 = vmatmul.msk.f32.vlgmr.msrb.gmra.mxu2 %vm56_vm1, %v262_v51 }
 0x43f   :  { %v288_v52 = vpop.f32.mrf.mxu2 }
 0x440   :  { %292 = vrot.lane.b32.xlu0 %v288_v52, %s408_s9 }
 0x4b2   :  { %v293_v57 = vpop.permute.xlu0 %292 }
 0x4b3   :  { %v295_v58 = vmul.f32 %v293_v57, %v195_v56 }
 0x4b5   :  { %297 = vrot.lane.b32.xlu1 %v295_v58, %s409_s10 }
 0x527   :  { %v298_v59 = vpop.permute.xlu1 %297 }
 0x528   :  { %v300_v60 = vsel %vm56_vm1, %v261_v50, %v298_v59 }
 0x529   :  { %302 = vst.msk [vmem:[#allocation2] sm:$0xff] %vm301_vm6, %v300_v60 }
 0x52a   :  { %313 = dma.vmem_to_hbm [thread:$0]  %s309_s29, 128, %s311_s13, [#allocation3]  }
 0x52b   :  { %406 = dma.done.wait [#allocation3], 128  }
 0x52c   :  { %407 = vsyncadd [#allocation3], 4294967168 }
 0x52d   :  { %318 = vsyncpa [#allocation3], 1 }

</bundles_post_ra>
